<compile_context>
chip_gen: v7x
topology: tpu7x:2x2x1
jax: 0.10.0
libtpu: 0.0.40
codegen_flags: <defaults>
</compile_context>

<pallas_src>
import jax
import jax.numpy as jnp
import numpy as np
from jax.experimental import pallas as pl
from jax.experimental.pallas import tpu as pltpu

BN_EPS = 1e-5  # PyTorch BatchNorm2d default


# ----------------------------- kernels --------------------------------------


def _stats_kernel(x_ref, w_ref, sum_ref, ssq_ref):
    """Accumulate per-out-channel sum and sum-of-squares of y = W @ x."""
    n = pl.program_id(0)
    t = pl.program_id(1)

    @pl.when((n == 0) & (t == 0))
    def _():
        sum_ref[...] = jnp.zeros_like(sum_ref)
        ssq_ref[...] = jnp.zeros_like(ssq_ref)

    # x_ref: (1, Cin, T)  w_ref: (Cout, Cin)
    y = jnp.dot(w_ref[...], x_ref[0], preferred_element_type=jnp.float32)  # (Cout, T)
    sum_ref[...] += jnp.sum(y, axis=-1, keepdims=True)        # lane-axis XLU reduce
    ssq_ref[...] += jnp.sum(y * y, axis=-1, keepdims=True)


def _norm_relu_kernel(x_ref, w_ref, scale_ref, shift_ref, o_ref):
    """Recompute y = W @ x for this tile and apply folded BN (scale/shift) + ReLU."""
    y = jnp.dot(w_ref[...], x_ref[0], preferred_element_type=jnp.float32)  # (Cout, T)
    y = y * scale_ref[...] + shift_ref[...]                                # (Cout,1) bcast
    o_ref[0] = jnp.maximum(y, 0.0).astype(o_ref.dtype)


# ----------------------------- wrapper ---------------------------------------


def _pick_hw_tile(hw, cap=2048):
    """Largest multiple of 128 that divides hw (capped); full extent if hw not 128-aligned."""
    if hw % 128 != 0:
        return hw  # block equal to full array dim is always legal
    t = min((cap // 128) * 128, hw)
    t = (t // 128) * 128
    while hw % t != 0:
        t -= 128
    return t


def conv_module_forward(x_nchw, weight, gamma, beta, *, hw_tile_cap=2048):
    """ConvModule(in_dim, out_dim) forward: relu(bn(conv1x1(x))).

    x_nchw : (N, Cin, H, W)
    weight : (Cout, Cin, 1, 1)   PyTorch conv weight layout
    gamma  : (Cout,)             BN weight
    beta   : (Cout,)             BN bias
    """
    N, Cin, H, W = x_nchw.shape
    Cout = weight.shape[0]
    HW = H * W
    M = N * HW

    T = _pick_hw_tile(HW, hw_tile_cap)
    num_t = HW // T

    # Layout glue: pure reshapes (no transposes, no extra HBM passes).
    x3 = x_nchw.reshape(N, Cin, HW)
    w2 = weight.reshape(Cout, Cin)

    xbytes = int(np.dtype(x_nchw.dtype).itemsize)
    mm_flops = 2 * M * Cin * Cout

    # ---- pass 1: batch statistics (sum, sum of squares) per out-channel ----
    sums, ssqs = pl.pallas_call(
        _stats_kernel,
        out_shape=(
            jax.ShapeDtypeStruct((Cout, 1), jnp.float32),
            jax.ShapeDtypeStruct((Cout, 1), jnp.float32),
        ),
        grid=(N, num_t),
        in_specs=[
            pl.BlockSpec((1, Cin, T), lambda n, t: (n, 0, t)),
            pl.BlockSpec((Cout, Cin), lambda n, t: (0, 0)),
        ],
        out_specs=(
            pl.BlockSpec((Cout, 1), lambda n, t: (0, 0)),
            pl.BlockSpec((Cout, 1), lambda n, t: (0, 0)),
        ),
        compiler_params=pltpu.CompilerParams(
            dimension_semantics=("arbitrary", "arbitrary")),
        cost_estimate=pl.CostEstimate(
            flops=mm_flops,
            transcendentals=0,
            bytes_accessed=M * Cin * xbytes + Cin * Cout * xbytes + 2 * Cout * 4),
    )(x3, w2)

    # Fold BN into per-channel scale/shift (tiny Cout-element math, f32).
    mean = sums[:, 0] / M
    var = jnp.maximum(ssqs[:, 0] / M - mean * mean, 0.0)
    inv = jax.lax.rsqrt(var + BN_EPS)
    g32 = gamma.astype(jnp.float32)
    b32 = beta.astype(jnp.float32)
    scale = (g32 * inv).reshape(Cout, 1)
    shift = (b32 - mean * g32 * inv).reshape(Cout, 1)

    # ---- pass 2: normalize + ReLU (recompute 1x1 conv per tile) ----
    out3 = pl.pallas_call(
        _norm_relu_kernel,
        out_shape=jax.ShapeDtypeStruct((N, Cout, HW), x_nchw.dtype),
        grid=(N, num_t),
        in_specs=[
            pl.BlockSpec((1, Cin, T), lambda n, t: (n, 0, t)),
            pl.BlockSpec((Cout, Cin), lambda n, t: (0, 0)),
            pl.BlockSpec((Cout, 1), lambda n, t: (0, 0)),
            pl.BlockSpec((Cout, 1), lambda n, t: (0, 0)),
        ],
        out_specs=pl.BlockSpec((1, Cout, T), lambda n, t: (n, 0, t)),
        compiler_params=pltpu.CompilerParams(
            dimension_semantics=("parallel", "parallel")),
        cost_estimate=pl.CostEstimate(
            flops=mm_flops,
            transcendentals=0,
            bytes_accessed=M * Cin * xbytes + M * Cout * xbytes),
    )(x3, w2, scale, shift)

    # (N, Cout, HW) -> NCHW with a free reshape (no transpose).
    return out3.reshape(N, Cout, H, W)

    # TODO(synk): kernel_size>1 / stride / padding / depthwise / non-(bn,relu)
    # ConvModule variants are not implemented; only the default config is covered.
    # TODO(synk): BatchNorm2d running_mean/running_var buffer updates (training
    # side effects) are not emitted; forward output is unaffected.


# ----------------------------- reference & test ------------------------------


def _reference(x_nchw, weight, gamma, beta):
    N, Cin, H, W = x_nchw.shape
    Cout = weight.shape[0]
    x2d = jnp.transpose(x_nchw, (0, 2, 3, 1)).reshape(-1, Cin).astype(jnp.float32)
    y = x2d @ weight.reshape(Cout, Cin).T.astype(jnp.float32)
    mean = y.mean(0, keepdims=True)
    var = ((y - mean) ** 2).mean(0, keepdims=True)
    y = (y - mean) / jnp.sqrt(var + BN_EPS) * gamma[None, :] + beta[None, :]
    y = jnp.maximum(y, 0.0)
    return jnp.transpose(y.reshape(N, H, W, Cout), (0, 3, 1, 2))


if __name__ == "__main__":
    # Small shapes consistent with ConvModule(in_dim=4, out_dim=8)
    N, Cin, H, W = 2, 4, 16, 16
    Cout = 8

    key = jax.random.PRNGKey(0)
    kx, kw = jax.random.split(key)

    x = jax.random.normal(kx, (N, Cin, H, W), dtype=jnp.float32)
    bound = 1.0 / np.sqrt(Cin)
    weight = jax.random.uniform(kw, (Cout, Cin, 1, 1), jnp.float32, -bound, bound)
    gamma = jnp.ones((Cout,), jnp.float32)   # BatchNorm2d defaults
    beta = jnp.zeros((Cout,), jnp.float32)

    # hw_tile_cap=128 exercises the multi-tile grid even at this toy shape.
    out = conv_module_forward(x, weight, gamma, beta, hw_tile_cap=128)
    jax.block_until_ready(out)

    ref = _reference(x, weight, gamma, beta)
    np.testing.assert_allclose(np.asarray(out), np.asarray(ref), rtol=1e-4, atol=1e-4)

    print("KERNEL_OK")
</pallas_src>

<mosaic_0001>
module attributes {stable_mosaic.version = 11 : i64} {
  func.func @_stats_kernel(%arg0: i32, %arg1: i32, %arg2: memref<1x4x128xf32, #tpu.memory_space<vmem>>, %arg3: memref<8x4xf32, #tpu.memory_space<vmem>>, %arg4: memref<8x1xf32, #tpu.memory_space<vmem>>, %arg5: memref<8x1xf32, #tpu.memory_space<vmem>>) attributes {dimension_semantics = [#tpu.dimension_semantics<arbitrary>, #tpu.dimension_semantics<arbitrary>], iteration_bounds = array<i64: 2, 2>, scalar_prefetch = 0 : i64, scratch_operands = 0 : i64, tpu.core_type = #tpu.core_type<tc>, window_params = [{transform_indices = @transform_0, window_bounds = array<i64: 1, 4, 128>}, {pipeline_mode = #tpu.pipeline_mode<synchronous>, transform_indices = @transform_1, window_bounds = array<i64: 8, 4>}, {pipeline_mode = #tpu.pipeline_mode<synchronous>, transform_indices = @transform_2, window_bounds = array<i64: 8, 1>}, {pipeline_mode = #tpu.pipeline_mode<synchronous>, transform_indices = @transform_3, window_bounds = array<i64: 8, 1>}]} {
    %c0_i32 = arith.constant 0 : i32
    %0 = arith.cmpi eq, %arg0, %c0_i32 : i32
    %c0_i32_0 = arith.constant 0 : i32
    %1 = arith.cmpi eq, %arg1, %c0_i32_0 : i32
    %2 = arith.andi %0, %1 : i1
    %3 = arith.extui %2 : i1 to i32
    %c0_i32_1 = arith.constant 0 : i32
    %4 = arith.cmpi ne, %3, %c0_i32_1 : i32
    scf.if %4 {
      %cst_16 = arith.constant 0.000000e+00 : f32
      %20 = vector.broadcast %cst_16 : f32 to vector<8x1xf32>
      %c0_17 = arith.constant 0 : index
      %c0_18 = arith.constant 0 : index
      %21 = vector.load %arg4[%c0_17, %c0_18] : memref<8x1xf32, #tpu.memory_space<vmem>>, vector<8x1xf32>
      tpu.vector_store %arg4[%c0_17, %c0_18], %20 {strides = array<i32>} : memref<8x1xf32, #tpu.memory_space<vmem>>, vector<8x1xf32>,
      %cst_19 = arith.constant 0.000000e+00 : f32
      %22 = vector.broadcast %cst_19 : f32 to vector<8x1xf32>
      %c0_20 = arith.constant 0 : index
      %c0_21 = arith.constant 0 : index
      %23 = vector.load %arg5[%c0_20, %c0_21] : memref<8x1xf32, #tpu.memory_space<vmem>>, vector<8x1xf32>
      tpu.vector_store %arg5[%c0_20, %c0_21], %22 {strides = array<i32>} : memref<8x1xf32, #tpu.memory_space<vmem>>, vector<8x1xf32>,
    } else {
    }
    %c0 = arith.constant 0 : index
    %c0_2 = arith.constant 0 : index
    %5 = vector.load %arg3[%c0, %c0_2] : memref<8x4xf32, #tpu.memory_space<vmem>>, vector<8x4xf32>
    %c0_3 = arith.constant 0 : index
    %c0_4 = arith.constant 0 : index
    %c0_5 = arith.constant 0 : index
    %6 = vector.load %arg2[%c0_3, %c0_4, %c0_5] : memref<1x4x128xf32, #tpu.memory_space<vmem>>, vector<1x4x128xf32>
    %7 = vector.shape_cast %6 : vector<1x4x128xf32> to vector<4x128xf32>
    %cst = arith.constant dense<0.000000e+00> : vector<8x128xf32>
    %8 = tpu.matmul %5, %7, %cst {dimension_numbers = #tpu.dot_dimension_numbers<[1], [0], [0], [1], [0, 0, 1, 1], [], []>} : vector<8x4xf32>, vector<4x128xf32>, vector<8x128xf32> -> vector<8x128xf32>
    %c0_6 = arith.constant 0 : index
    %c0_7 = arith.constant 0 : index
    %9 = vector.load %arg4[%c0_6, %c0_7] : memref<8x1xf32, #tpu.memory_space<vmem>>, vector<8x1xf32>
    %cst_8 = arith.constant dense<0.000000e+00> : vector<8xf32>
    %10 = vector.multi_reduction <add>, %8, %cst_8 [1] : vector<8x128xf32> to vector<8xf32>
    %11 = vector.shape_cast %10 : vector<8xf32> to vector<8x1xf32>
    %12 = arith.addf %9, %11 : vector<8x1xf32>
    %c0_9 = arith.constant 0 : index
    %c0_10 = arith.constant 0 : index
    %13 = vector.load %arg4[%c0_9, %c0_10] : memref<8x1xf32, #tpu.memory_space<vmem>>, vector<8x1xf32>
    tpu.vector_store %arg4[%c0_9, %c0_10], %12 {strides = array<i32>} : memref<8x1xf32, #tpu.memory_space<vmem>>, vector<8x1xf32>,
    %c0_11 = arith.constant 0 : index
    %c0_12 = arith.constant 0 : index
    %14 = vector.load %arg5[%c0_11, %c0_12] : memref<8x1xf32, #tpu.memory_space<vmem>>, vector<8x1xf32>
    %15 = arith.mulf %8, %8 : vector<8x128xf32>
    %cst_13 = arith.constant dense<0.000000e+00> : vector<8xf32>
    %16 = vector.multi_reduction <add>, %15, %cst_13 [1] : vector<8x128xf32> to vector<8xf32>
    %17 = vector.shape_cast %16 : vector<8xf32> to vector<8x1xf32>
    %18 = arith.addf %14, %17 : vector<8x1xf32>
    %c0_14 = arith.constant 0 : index
    %c0_15 = arith.constant 0 : index
    %19 = vector.load %arg5[%c0_14, %c0_15] : memref<8x1xf32, #tpu.memory_space<vmem>>, vector<8x1xf32>
    tpu.vector_store %arg5[%c0_14, %c0_15], %18 {strides = array<i32>} : memref<8x1xf32, #tpu.memory_space<vmem>>, vector<8x1xf32>,
    return
  }
  func.func @transform_0(%arg0: i32, %arg1: i32) -> (i32, i32, i32) {
    %c0_i32 = arith.constant 0 : i32
    %c0_i32_0 = arith.constant 0 : i32
    return %arg0, %c0_i32, %arg1 : i32, i32, i32
  }
  func.func @transform_1(%arg0: i32, %arg1: i32) -> (i32, i32) {
    %c0_i32 = arith.constant 0 : i32
    %c0_i32_0 = arith.constant 0 : i32
    %c0_i32_1 = arith.constant 0 : i32
    return %c0_i32, %c0_i32_0 : i32, i32
  }
  func.func @transform_2(%arg0: i32, %arg1: i32) -> (i32, i32) {
    %c0_i32 = arith.constant 0 : i32
    %c0_i32_0 = arith.constant 0 : i32
    %c0_i32_1 = arith.constant 0 : i32
    return %c0_i32, %c0_i32_0 : i32, i32
  }
  func.func @transform_3(%arg0: i32, %arg1: i32) -> (i32, i32) {
    %c0_i32 = arith.constant 0 : i32
    %c0_i32_0 = arith.constant 0 : i32
    %c0_i32_1 = arith.constant 0 : i32
    return %c0_i32, %c0_i32_0 : i32, i32
  }
}

</mosaic_0001>

<bundles_post_ra>
// kernel: tpu_custom_call.1
= control target key start
LH: loop header
LB: loop body
LE: loop exit
PB: predicated region body
PF: predicated region fallthrough
CT: control target
= control target key end

     0   :  { %9 = vsyncpa [#allocation3], 0  ;;  %s730_s0 = inlined_call_operand.hbm [shape: f32[2,4,256], index: 0, kind: input, shape index: {}]   ;;  %s731_s1 = inlined_call_operand.vmem [shape: f32[8,4], index: 1, kind: input, shape index: {}]   ;;  %s732_s2 = inlined_call_operand.vmem [shape: f32[8,1], index: 2, kind: output, shape index: {0}]   ;;  %s733_s3 = inlined_call_operand.vmem [shape: f32[8,1], index: 3, kind: output, shape index: {1}]  }
   0x1   :  { %11 = vsyncpa [#allocation3 + $0x1], 0  ;;  %s562_s12 = smov 0   ;;  %s564_s13 = smov 0  }
   0x2   :  { %s566_s14 = smov 0   ;;  %s568_s15 = smov 0  }
   0x3   :  { %s570_s16 = smov 0   ;;  %s572_s17 = smov 0  }
   0x4   :  { %s574_s18 = smov 0   ;;  %s576_s19 = smov 0  }
   0x5 LB: > { %s347_s20 = sadd.s32 4294967295, %s536_s19   ;;  %s26_s21 = sadd.s32 1, %s528_s17  ;;  %s536_s19 = sphi %s576_s19, %s17_s19   ;;  %s532_s18 = sphi %s574_s18, %s745_s18   ;;  %s528_s17 = sphi %s572_s17, %s744_s17   ;;  %s524_s16 = sphi %s570_s16, %s743_s16   ;;  %s520_s15 = sphi %s568_s15, %s742_s15   ;;  %s516_s14 = sphi %s566_s14, %s741_s14   ;;  %s512_s13 = sphi %s564_s13, %s740_s13   ;;  %s508_s12 = sphi %s562_s12, %s739_s12  }
   0x6   : > { %p27_p0 = scmp.ge.s32.totalorder %s26_s21, 2  ;;  %s29_s22 = sadd.s32 1, %s532_s18 }
   0x7   : > { %s38_s23 = sadd.s32 1, %s516_s14  ;;  %p45_p1 = scmp.ne.s32.totalorder %s516_s14, %s512_s13 }
   0x8   : > { %s747_s21 = smov (%p27_p0, %s26_s21), 0  ;;  %s749_s22 = smov (!%p27_p0, %s29_s22), %s532_s18 }
   0x9   : > { %s34_s24 = ssub.s32 %s528_s17, %s747_s21  ;;  %p46_p2 = scmp.eq.s32.totalorder %s536_s19, 0 }
   0xa   : > { %p31_p3 = scmp.ge.s32.totalorder %s749_s22, 2  ;;  %p51_p4 = scmp.ne.s32.totalorder %s512_s13, %s508_s12 }
   0xb   : > { %p613_p5 = por %p46_p2, %p45_p1  ;;  %p52_p6 = scmp.eq.s32.totalorder %s347_s20, 0 }
   0xc   : > { %s751_s22 = smov (%p31_p3, %s749_s22), 0  ;;  %p372_p8 = scmp.lt.s32.totalorder %s536_s19, 4 }
   0xd   : > { %p619_p7 = por %p52_p6, %p51_p4  ;;  %s33_s27 = ssub.s32 %s532_s18, %s751_s22 }
   0xe   : > { %s35_s28 = sor.u32 %s34_s24, %s33_s27  ;;  %s141_s29 = sand.u32 1, %s516_s14  }
   0xf   : > { %p36_p9 = scmp.eq.s32.totalorder %s35_s28, 0  ;;  %s350_s30 = sshll.u32 %s141_s29, 2 }
  0x10   : > { %s351_s4 = sshll.u32 %s532_s18, 1  ;;  %s145_s8 = scalar_lea.vmem [#allocation2], %s350_s30 }
  0x11   : > { %s629_s5 = scalar_select %p36_p9, %s516_s14, %s38_s23  }
  0x12   : > { %s150_s6 = sadd.s32 %s528_s17, %s351_s4  ;;  %s154_s9 = sshll.u32 %s145_s8, 4  ;;  %s637_s9 = int_to_ptr.vmem [resolvable:$true] %s154_s9 }
  0x13   : > { %s352_s7 = sshll.u32 %s150_s6, 6  ;;  %p643_p10 = pnand %p372_p8, %p613_p5 }
  0x14   : > { %s635_s12 = scalar_lea.hbm %s730_s0, %s352_s7  ;;  %s142_s23 = scalar_lea.sflag [#allocation3], %s141_s29 }
  0x15   : > { %s440_s24 = scalar_lea.hbm %s635_s12, 64  ;;  %p442_p0 = pneg %p643_p10 }
  0x16   : > { %p441_p13 = scmp.ne.s32.totalorder %s635_s12, %s440_s24  ;;  %s445_s28 = scalar_lea.hbm %s730_s0, 256 }
  0x17   : > { %p446_p3 = scmp.lt.u32.totalorder %s635_s12, %s730_s0  ;;  %p447_p4 = scmp.lt.u32.totalorder %s445_s28, %s440_s24 }
  0x18   : > { %p443_p1 = pnand %p442_p0, %p441_p13  ;;  %p449_p6 = scmp.lt.u32.totalorder %s440_s24, %s635_s12 }
  0x19   : > { %p448_p5 = por %p447_p4, %p446_p3 }
  0x1a   : > { %p444_p2 = pneg %p443_p1 }
  0x1b   : > { %p450_p8 = por %p449_p6, %p448_p5 }
  0x1d   : > { %p451_p9 = pnand %p450_p8, %p444_p2 }
  0x1f   : > { %454 = shalt.err (!%p451_p9)
}
  0x20   : > { %s455_s29 = scalar_lea.vmem %s637_s9, 64  ;;  %s538_s6 = smov [#allocation2]  }
  0x21   : > { %p456_p13 = scmp.ne.s32.totalorder %s637_s9, %s455_s29  ;;  %s460_s7 = sshll.u32 %s538_s6, 4  ;;  %s461_s7 = int_to_ptr.vmem [resolvable:$false] %s460_s7 }
  0x22   : > { %s462_s8 = scalar_lea.vmem %s461_s7, 128  ;;  %p463_p12 = scmp.lt.s32.totalorder %s637_s9, %s461_s7 }
  0x23   : > { %p458_p1 = pnand %p456_p13, %p442_p0  ;;  %p464_p3 = scmp.lt.s32.totalorder %s462_s8, %s455_s29 }
  0x25   : > { %p459_p11 = pneg %p458_p1  ;;  %p465_p4 = por %p464_p3, %p463_p12 }
  0x27   : > { %p466_p5 = pnand %p465_p4, %p459_p11 }
  0x29   : > { %469 = shalt.err (!%p466_p5)
}
  0x2a   : > { %371 = dma.hbm_to_vmem [thread:$0]  (!%p643_p10), %s635_s12, 64, %s637_s9, %s142_s23  }
  0x2b   : > { %p737_p2 = scmp.lt.s32.totalorder %s536_s19, 5  ;;  %p738_p6 = scmp.ge.s32.totalorder %s536_s19, 1 }
  0x2d   : > { %p160_p0 = pnand %p738_p6, %p737_p2 }
  0x2e   : > { %s165_s10 = sand.u32 (!%p160_p0), 1, %s512_s13  }
  0x2f   : > { %163 = sbr.rel (%p160_p0) target bundleno = 430 (0x1ae), region = 28  ;;  %s354_s11 = sshll.u32 (!%p160_p0), %s165_s10, 2 }
  0x30   : > { %s166_s24 = scalar_lea.sflag (!%p160_p0), [#allocation3], %s165_s10  ;;  %s169_s27 = scalar_lea.vmem (!%p160_p0), [#allocation2], %s354_s11 }
  0x36   : > { %503 = dma.done.wait (%p619_p7), %s166_s24, 64  }
  0x37   : > { %505 = vsyncadd (%p619_p7), %s166_s24, 4294967232  ;;  %p187_p11 = scmp.eq.s32.totalorder %s524_s16, 0  ;;  %p188_p12 = scmp.eq.s32.totalorder %s520_s15, 0 }
  0x39   : > { %p189_p10 = pnand %p188_p12, %p187_p11 }
  0x3a   : > { %vm193_vm0 = vcmask (!%p189_p10), 7168   ;;  %v539_v0 = vmov (!%p189_p10), 0.0  }
  0x3b   : > { %192 = sbr.rel (%p189_p10) target bundleno = 66 (0x42), region = 36  ;;  %194 = vst.msk [vmem:[%s732_s2] sm:$0xff] (!%p189_p10), %vm193_vm0, %v539_v0  ;;  %195 = vst.msk [vmem:[%s733_s3] sm:$0xff] (!%p189_p10), %vm193_vm0, %v539_v0 }
  0x42 PF: > { %v197_v1 = vld [vmem:[%s169_s27] sm:$0xf]  ;;  %vm202_vm1 = vcmask 1043456   ;;  %v540_v3 = vmov 0.0   ;;  %vm541_vm2 = vmmov 0   ;;  %vm198_vm3 = vcmask 31744  }
  0x43   : > { %v196_v2 = vld [vmem:[%s731_s1] sm:$0xff]  ;;  %361 = vmatprep.subr.mxu0 %v540_v3  ;;  %363 = vmatprep.mubr.msk.f32.mxu0 %vm541_vm2, %v540_v3  ;;  %vm280_vm4 = vcmask 7168  }
  0x44   : > { %362 = vmatpush3.msk.msra.mxu0 %vm202_vm1, %v197_v1  ;;  %v276_v7 = vld [vmem:[%s732_s2] sm:$0xff] }
  0x45   : > { %364 = vmatmul.mubr.msk.f32.vlgmr.msra.gmra.mrb[0].mxu0 %vm198_vm3, %v196_v2  ;;  %v282_v10 = vld [vmem:[%s733_s3] sm:$0xff] }
 0x118   : > { %v272_v4 = vpop.f32.mrb[0].mxu0 }
 0x119   : > { %277 = vadd.xlane.f32.xlu0 %v272_v4  ;;  %v365_v5 = vpop.f32.mrb[1].mxu0  ;;  %v283_v6 = vmul.f32 %v272_v4, %v272_v4 }
 0x11d   : > { %284 = vadd.xlane.f32.xlu0 %v283_v6 }
 0x1a6   : > { %v278_v8 = vpop.xlane.xlu0 %277 }
 0x1a7   : > { %v279_v9 = vadd.f32 %v278_v8, %v276_v7 }
 0x1a9   : > { %281 = vst.msk [vmem:[%s732_s2] sm:$0xff] %vm280_vm4, %v279_v9 }
 0x1aa   : > { %v285_v11 = vpop.xlane.xlu0 %284 }
 0x1ab   : > { %v286_v12 = vadd.f32 %v285_v11, %v282_v10 }
 0x1ad   : > { %287 = vst.msk [vmem:[%s733_s3] sm:$0xff] %vm280_vm4, %v286_v12 }
 0x1ae PF: > { %s17_s19 = sadd.s32 1, %s536_s19   ;;  %s739_s12 = smov %s512_s13 }
 0x1af   : > { %p14_p7 = scmp.ge.s32.totalorder %s17_s19, 6   ;;  %s740_s13 = smov %s516_s14 }
 0x1b0   : > { %s741_s14 = smov %s629_s5  ;;  %s742_s15 = smov %s528_s17 }
 0x1b1   : > { %s743_s16 = smov %s532_s18  ;;  %s744_s17 = smov %s747_s21 }
 0x1b2   : > { %s745_s18 = smov %s751_s22  ;;  %16 = sbr.rel (!%p14_p7) target bundleno = 5 (0x5), region = 76 }
 0x1b9   :  { %305 = vsyncpa [#allocation3], 1 }
 0x1ba   :  { %307 = vsyncpa [#allocation3 + $0x1], 1 }

</bundles_post_ra>
